<compile_context>
chip_gen: v7x
topology: tpu7x:2x2x1
jax: 0.10.0
libtpu: 0.0.40
codegen_flags: <defaults>
</compile_context>

<pallas_src>
import functools

import jax
import jax.numpy as jnp
from jax.experimental import pallas as pl
from jax.experimental.pallas import tpu as pltpu


def _round_up(v: int, m: int) -> int:
    return (v + m - 1) // m * m


def _patch_embed_kernel(p_ref, w_ref, b_ref, o_ref):
    # p_ref: (TM, K)  bf16 patches tile (pipelined over the M grid)
    # w_ref: (K,  Ep) bf16 projection weight (grid-invariant, single-buffered)
    # b_ref: (1,  Ep) f32 bias (grid-invariant, single-buffered)
    # o_ref: (TM, Ep) output tile
    acc = jnp.dot(p_ref[...], w_ref[...], preferred_element_type=jnp.float32)
    o_ref[...] = (acc + b_ref[...]).astype(o_ref.dtype)


def patch_embed_pallas(x, weight, bias, *, patch_size, tm=512, out_dtype=None):
    """x: (B, C, H, W) NCHW, weight: (E, C, p, p), bias: (E,).

    Returns (B, n_patches, E), same semantics as
    proj(x).flatten(2).transpose(1, 2) of the PyTorch module (bf16 matmul
    operands, f32 accumulation).  Call under jax.jit so the patch-extraction
    producer can fuse into the kernel's input DMA (allow_input_fusion).
    """
    B, C, H, W = x.shape
    E = weight.shape[0]
    p = patch_size
    Hp, Wp = H // p, W // p
    if (Hp * p, Wp * p) != (H, W):
        # nn.Conv2d with stride == kernel silently ignores trailing pixels.
        x = x[:, :, : Hp * p, : Wp * p]
    n_patches = Hp * Wp
    K = C * p * p
    M = B * n_patches

    compute_dtype = jnp.bfloat16
    out_dtype = x.dtype if out_dtype is None else jnp.dtype(out_dtype)
    out_itemsize = jnp.dtype(out_dtype).itemsize

    # --- glue: cast first (halves transpose traffic), then extract patches.
    # Kept outside the kernel but fusible into the input DMA (see
    # allow_input_fusion below) so it need not be materialized in HBM.
    # (B, C, Hp, p, Wp, p) -> (B, Hp, Wp, C, p, p) -> (B*n_patches, C*p*p)
    xb = x.astype(compute_dtype)
    patches = xb.reshape(B, C, Hp, p, Wp, p)
    patches = patches.transpose(0, 2, 4, 1, 3, 5)
    patches = patches.reshape(M, K)

    # conv weight (E, C, p, p) -> matmul weight (K, E); bias kept in f32.
    w2d = weight.reshape(E, K).T.astype(compute_dtype)
    b2d = bias.reshape(1, E).astype(jnp.float32)

    # Pad only the (small) weight/bias output lanes to a 128 multiple so the
    # output stores are lane-dense.  For real ViT embed dims (768/1024/...)
    # this is a no-op.  K is deliberately NOT padded: the blocks carry the
    # full K dim, which Pallas accepts regardless of alignment.
    Ep = _round_up(E, 128)
    if Ep != E:
        w2d = jnp.pad(w2d, ((0, 0), (0, Ep - E)))
        b2d = jnp.pad(b2d, ((0, 0), (0, Ep - E)))

    # --- M tiling: ragged last tile (no jnp.pad of the big patches array).
    # Shrink the tile for small M so the "parallel" axis has >= 2 steps and
    # both v7x TensorCores are used.
    if M >= 2 * tm:
        TM = tm
    else:
        TM = min(_round_up(max(pl.cdiv(M, 2), 8), 16), _round_up(M, 16))
    grid_m = pl.cdiv(M, TM)

    # --- VMEM budget: 2x patch buffers + 2x out buffers + 1x weight + bias,
    # with 2x headroom, capped at 48 MiB (v7x has 64 MiB physical per TC).
    footprint = (2 * TM * K * 2          # double-buffered bf16 patches
                 + K * Ep * 2            # single-buffered bf16 weight
                 + Ep * 4                # bias
                 + 2 * TM * Ep * out_itemsize)
    vmem_limit = int(min(48 * 1024 * 1024, max(2 * footprint, 16 * 1024 * 1024)))

    cost = pl.CostEstimate(
        flops=2 * M * K * Ep,
        transcendentals=0,
        bytes_accessed=(M * K * 2 + K * Ep * 2 + Ep * 4 + M * Ep * out_itemsize),
    )

    out = pl.pallas_call(
        _patch_embed_kernel,
        out_shape=jax.ShapeDtypeStruct((M, Ep), out_dtype),
        grid_spec=pltpu.PrefetchScalarGridSpec(
            num_scalar_prefetch=0,
            grid=(grid_m,),
            in_specs=[
                # patches: tiled over M (software-pipelined, double-buffered)
                pl.BlockSpec((TM, K), lambda i: (i, 0)),
                # weight/bias: grid-invariant -> DMA'd once, single buffer
                pl.BlockSpec((K, Ep), lambda i: (0, 0),
                             pipeline_mode=pl.Buffered(1)),
                pl.BlockSpec((1, Ep), lambda i: (0, 0),
                             pipeline_mode=pl.Buffered(1)),
            ],
            out_specs=pl.BlockSpec((TM, Ep), lambda i: (i, 0)),
        ),
        compiler_params=pltpu.CompilerParams(
            dimension_semantics=("parallel",),
            vmem_limit_bytes=vmem_limit,
            allow_input_fusion=[True, False, False],
        ),
        cost_estimate=cost,
    )(patches, w2d, b2d)

    # strip lane padding (no-op when E % 128 == 0) and restore (B, N, E)
    if Ep != E:
        out = out[:, :E]
    return out.reshape(B, n_patches, E)


def reference_patch_embed(x, weight, bias, patch_size, precision=None):
    """Pure-JAX reference mirroring nn.Conv2d(stride=kernel=p) + flatten + transpose."""
    out = jax.lax.conv_general_dilated(
        x, weight,
        window_strides=(patch_size, patch_size),
        padding="VALID",
        dimension_numbers=("NCHW", "OIHW", "NCHW"),
        precision=precision,
    ) + bias.reshape(1, -1, 1, 1)
    B, E, Hp, Wp = out.shape
    return out.reshape(B, E, Hp * Wp).transpose(0, 2, 1)


if __name__ == "__main__":
    # Small shapes consistent with the module: img_size=16, patch_size=4,
    # in_chans=4, embed_dim=32  ->  n_patches = (16//4)**2 = 16
    B, C, IMG, P, E = 2, 4, 16, 4, 32

    key = jax.random.PRNGKey(0)
    kx, kw, kb = jax.random.split(key, 3)
    x = jax.random.normal(kx, (B, C, IMG, IMG), dtype=jnp.float32)
    weight = jax.random.normal(kw, (E, C, P, P), dtype=jnp.float32) * 0.02
    bias = jax.random.normal(kb, (E,), dtype=jnp.float32) * 0.01

    # jit so the patch-extraction glue can fuse into the kernel's input DMA.
    patch_embed = jax.jit(functools.partial(patch_embed_pallas, patch_size=P))
    out = jax.block_until_ready(patch_embed(x, weight, bias))
    assert out.shape == (B, (IMG // P) ** 2, E), out.shape

    # Tight check against a reference using the same bf16-rounded operands
    # (isolates accumulation-order differences only).
    ref_bf16 = reference_patch_embed(
        x.astype(jnp.bfloat16).astype(jnp.float32),
        weight.astype(jnp.bfloat16).astype(jnp.float32),
        bias, P, precision=jax.lax.Precision.HIGHEST)
    assert jnp.allclose(out, ref_bf16, atol=1e-3, rtol=1e-3), float(
        jnp.max(jnp.abs(out - ref_bf16)))

    # Loose check against the full-f32 conv reference (module semantics).
    ref_f32 = reference_patch_embed(x, weight, bias, P)
    assert jnp.allclose(out, ref_f32, atol=1e-2, rtol=1e-2), float(
        jnp.max(jnp.abs(out - ref_f32)))

    print("KERNEL_OK")
</pallas_src>

<mosaic_0001>
module attributes {stable_mosaic.version = 11 : i64} {
  func.func @_patch_embed_kernel(%arg0: i32, %arg1: memref<16x64xbf16, #tpu.memory_space<vmem>>, %arg2: memref<64x128xbf16, #tpu.memory_space<vmem>>, %arg3: memref<1x128xf32, #tpu.memory_space<vmem>>, %arg4: memref<16x128xf32, #tpu.memory_space<vmem>>) attributes {dimension_semantics = [#tpu.dimension_semantics<parallel>], iteration_bounds = array<i64: 2>, scalar_prefetch = 0 : i64, scratch_operands = 0 : i64, tpu.core_type = #tpu.core_type<tc>, window_params = [{transform_indices = @transform_0, window_bounds = array<i64: 16, 64>}, {pipeline_mode = #tpu.pipeline_mode<synchronous>, transform_indices = @transform_1, window_bounds = array<i64: 64, 128>}, {pipeline_mode = #tpu.pipeline_mode<synchronous>, transform_indices = @transform_2, window_bounds = array<i64: 1, 128>}, {transform_indices = @transform_3, window_bounds = array<i64: 16, 128>}]} {
    %c0 = arith.constant 0 : index
    %c0_0 = arith.constant 0 : index
    %0 = vector.load %arg1[%c0, %c0_0] : memref<16x64xbf16, #tpu.memory_space<vmem>>, vector<16x64xbf16>
    %c0_1 = arith.constant 0 : index
    %c0_2 = arith.constant 0 : index
    %1 = vector.load %arg2[%c0_1, %c0_2] : memref<64x128xbf16, #tpu.memory_space<vmem>>, vector<64x128xbf16>
    %cst = arith.constant dense<0.000000e+00> : vector<16x128xf32>
    %2 = tpu.matmul %0, %1, %cst {dimension_numbers = #tpu.dot_dimension_numbers<[1], [0], [0], [1], [0, 0, 1, 1], [], []>} : vector<16x64xbf16>, vector<64x128xbf16>, vector<16x128xf32> -> vector<16x128xf32>
    %c0_3 = arith.constant 0 : index
    %c0_4 = arith.constant 0 : index
    %3 = vector.load %arg3[%c0_3, %c0_4] : memref<1x128xf32, #tpu.memory_space<vmem>>, vector<1x128xf32>
    %4 = vector.broadcast %3 : vector<1x128xf32> to vector<16x128xf32>
    %5 = arith.addf %2, %4 : vector<16x128xf32>
    %c0_5 = arith.constant 0 : index
    %c0_6 = arith.constant 0 : index
    %6 = vector.load %arg4[%c0_5, %c0_6] : memref<16x128xf32, #tpu.memory_space<vmem>>, vector<16x128xf32>
    tpu.vector_store %arg4[%c0_5, %c0_6], %5 {strides = array<i32>} : memref<16x128xf32, #tpu.memory_space<vmem>>, vector<16x128xf32>,
    return
  }
  func.func @transform_0(%arg0: i32) -> (i32, i32) {
    %c0_i32 = arith.constant 0 : i32
    %c0_i32_0 = arith.constant 0 : i32
    return %arg0, %c0_i32 : i32, i32
  }
  func.func @transform_1(%arg0: i32) -> (i32, i32) {
    %c0_i32 = arith.constant 0 : i32
    %c0_i32_0 = arith.constant 0 : i32
    %c0_i32_1 = arith.constant 0 : i32
    return %c0_i32, %c0_i32_0 : i32, i32
  }
  func.func @transform_2(%arg0: i32) -> (i32, i32) {
    %c0_i32 = arith.constant 0 : i32
    %c0_i32_0 = arith.constant 0 : i32
    %c0_i32_1 = arith.constant 0 : i32
    return %c0_i32, %c0_i32_0 : i32, i32
  }
  func.func @transform_3(%arg0: i32) -> (i32, i32) {
    %c0_i32 = arith.constant 0 : i32
    %c0_i32_0 = arith.constant 0 : i32
    return %arg0, %c0_i32 : i32, i32
  }
}

</mosaic_0001>

<bundles_post_ra>
// kernel: patch_embed_pallas.1
= control target key start
LH: loop header
LB: loop body
LE: loop exit
PB: predicated region body
PF: predicated region fallthrough
CT: control target
= control target key end

     0   :  { %8 = vsyncpa [#allocation3], 0  ;;  %s633_s0 = inlined_call_operand.vmem [shape: bf16[32,64], index: 0, kind: input, shape index: {}]   ;;  %s634_s1 = inlined_call_operand.vmem [shape: bf16[64,128], index: 1, kind: input, shape index: {}]   ;;  %s635_s2 = inlined_call_operand.vmem [shape: f32[1,128], index: 2, kind: input, shape index: {}]   ;;  %s636_s3 = inlined_call_operand.hbm [shape: f32[32,128], index: 3, kind: output, shape index: {}]  }
   0x1   :  { %10 = vsyncpa [#allocation3 + $0x1], 0  ;;  %s516_s12 = smov 0   ;;  %s518_s13 = smov 0  }
   0x2   :  { %s520_s14 = smov 0   ;;  %s522_s15 = smov 0  }
   0x3 LB: > { %s537_s16 = sadd.s32 4294967295, %s489_s15   ;;  %s342_s17 = sadd.s32 4294967294, %s489_s15   ;;  %s489_s15 = sphi %s522_s15, %s642_s15   ;;  %s485_s14 = sphi %s520_s14, %s641_s14   ;;  %s481_s13 = sphi %s518_s13, %s640_s13   ;;  %s477_s12 = sphi %s516_s12, %s639_s12  }
   0x4   : > { %s541_s18 = sadd.s32 1, %s489_s15   ;;  %s91_s19 = sadd.s32 1, %s485_s14 }
   0x5   : > { %s88_s20 = ssub.s32 %s489_s15, %s541_s18  ;;  %p101_p0 = scmp.ne.s32.totalorder %s485_s14, %s481_s13 }
   0x6   : > { %p89_p1 = scmp.eq.s32.totalorder %s88_s20, 0  ;;  %p102_p2 = scmp.eq.s32.totalorder %s537_s16, 1 }
   0x7   : > { %p107_p3 = scmp.ne.s32.totalorder %s481_s13, %s477_s12  ;;  %p108_p4 = scmp.eq.s32.totalorder %s342_s17, 1 }
   0x8   : > { %s552_s21 = scalar_select %p89_p1, %s485_s14, %s91_s19  }
   0x9   : > { %p554_p5 = por %p102_p2, %p101_p0  ;;  %p558_p6 = por %p108_p4, %p107_p3 }
   0xa   : > { %p345_p7 = scmp.ge.s32.totalorder %s489_s15, 1  ;;  %p141_p8 = scmp.lt.s32.totalorder %s489_s15, 3 }
   0xc   : > { %p142_p9 = pnand %p345_p7, %p141_p8 }
   0xd   : > { %v422_v0 = vld [vmem:[%s634_s1] sm:$0xff] (!%p142_p9)   ;;  %v491_v1 = vmov (!%p142_p9), 0.0   ;;  %v423_v2 = vld [vmem:[%s634_s1 + $0x8] sm:$0xff] (!%p142_p9)   ;;  %vm492_vm0 = vmmov (!%p142_p9), 0   ;;  %s347_s28 = sshll.u32 (!%p142_p9), %s537_s16, 1  ;;  %v424_v3 = vld [vmem:[%s634_s1 + $0x10] sm:$0xff] (!%p142_p9)  }
   0xe   : > { %145 = sbr.rel (%p142_p9) target bundleno = 261 (0x105), region = 32  ;;  %367 = vmatprep.subr.bf16.mxu0 (!%p142_p9), %v491_v1  ;;  %375 = vmatprep.mubr.msk.bf16.mxu0 (!%p142_p9), %vm492_vm0, %v491_v1  ;;  %p166_p10 = scmp.lt.s32.totalorder (!%p142_p9), %s347_s28, 3  ;;  %v425_v4 = vld [vmem:[%s634_s1 + $0x18] sm:$0xff] (!%p142_p9)   ;;  %vm219_vm1 = vcmask (!%p142_p9), 523264   ;;  %v349_v6 = vld [vmem:[%s635_s2] ss:$0 sm:$0xff] (!%p142_p9) }
   0xf   : > { %368 = vmatpush3.bf16.msra.mxu0 (!%p142_p9), %v422_v0  ;;  %s162_s10 = sand.u32 (!%p142_p9), 1, %s481_s13   ;;  %s361_s25 = sshll.u32 (!%p142_p9), %s537_s16, 8 }
  0x10   : > { %369 = vmatprep.subr.bf16.mxu0 (!%p142_p9), %v491_v1  ;;  %s346_s11 = sshll.u32 (!%p142_p9), %s162_s10, 4  ;;  %s592_s29 = scalar_lea.sflag (!%p142_p9), [#allocation3], %s162_s10 }
  0x11   : > { %s164_s20 = scalar_lea.vmem (!%p142_p9), [#allocation2], %s346_s11  ;;  %s493_s30 = smov (!%p142_p9), [#allocation2]  }
  0x12   : > { %s280_s24 = sshll.u32 (!%p142_p9), %s164_s20, 4  ;;  %s585_s24 = int_to_ptr.vmem [resolvable:$true] %s280_s24 }
  0x13   : > { %370 = vmatpush3.bf16.msra.mxu0 (!%p142_p9), %v423_v2  ;;  %s427_s16 = scalar_lea.vmem (!%p142_p9), %s585_s24, 256 }
  0x14   : > { %371 = vmatprep.subr.bf16.mxu0 (!%p142_p9), %v491_v1  ;;  %p428_p11 = scmp.ne.s32.totalorder (!%p142_p9), %s585_s24, %s427_s16 }
  0x15   : > { %s644_s28 = smov (!%p166_p10, %s347_s28), 3 }
  0x16   : > { %s348_s4 = sshll.u32 %s644_s28, 2  ;;  %s590_s28 = scalar_lea.hbm %s636_s3, %s361_s25 }
  0x17   : > { %s169_s7 = scalar_lea.vmem %s633_s0, %s348_s4  ;;  %372 = vmatpush3.bf16.msra.mxu0 %v424_v3  ;;  %p429_p12 = pnand %p428_p11, %p554_p5 }
  0x18   : > { %373 = vmatprep.subr.bf16.mxu0 %v491_v1  ;;  %v426_v5 = vld [vmem:[%s169_s7] sm:$0xff]   ;;  %s431_s4 = sshll.u32 %s493_s30, 4  ;;  %s432_s4 = int_to_ptr.vmem [resolvable:$false] %s431_s4 }
  0x19   : > { %p430_p13 = pneg %p429_p12  ;;  %s433_s5 = scalar_lea.vmem %s432_s4, 512 }
  0x1a   : > { %p434_p0 = scmp.lt.s32.totalorder %s585_s24, %s432_s4  ;;  %p435_p1 = scmp.lt.s32.totalorder %s433_s5, %s427_s16 }
  0x1b   : > { %374 = vmatpush3.bf16.msra.mxu0 %v425_v4 }
  0x1c   : > { %p436_p2 = por %p435_p1, %p434_p0 }
  0x1e   : > { %376 = vmatmul.mubr.msk.bf16.vlgmr.msra.gmra.mrb[0].mxu0 %vm219_vm1, %v426_v5  ;;  %p437_p3 = pnand %p436_p2, %p430_p13 }
  0xf1   : > { %v257_v7 = vpop.f32.mrb[0].mxu0 }
  0xf2   : > { %v258_v8 = vadd.f32 %v349_v6, %v257_v7  ;;  %v377_v9 = vpop.f32.mrb[1].mxu0 }
  0xf3   : > { %v260_v10 = vpop.f32.mrb[2].mxu0 }
  0xf4   : > { %264 = vst [vmem:[%s164_s20] sm:$0xff] %v258_v8  ;;  %v261_v11 = vadd.f32 %v349_v6, %v260_v10  ;;  %v378_v12 = vpop.f32.mrb[3].mxu0 }
  0xf6   : > { %265 = vst [vmem:[%s164_s20 + $0x8] sm:$0xff] %v261_v11 }
  0xf7   : > { %440 = shalt.err (!%p437_p3)
}
  0xf8   : > { %s441_s6 = scalar_lea.hbm %s590_s28, 256  ;;  %s445_s9 = scalar_lea.hbm %s636_s3, 512 }
  0xf9   : > { %p442_p4 = scmp.ne.s32.totalorder %s590_s28, %s441_s6  ;;  %p446_p9 = scmp.lt.u32.totalorder %s590_s28, %s636_s3 }
  0xfa   : > { %p447_p10 = scmp.lt.u32.totalorder %s445_s9, %s441_s6  ;;  %p449_p12 = scmp.lt.u32.totalorder %s441_s6, %s590_s28 }
  0xfb   : > { %p443_p7 = pnand %p442_p4, %p554_p5 }
  0xfc   : > { %p448_p11 = por %p447_p10, %p446_p9 }
  0xfd   : > { %p444_p8 = pneg %p443_p7 }
  0xfe   : > { %p450_p13 = por %p449_p12, %p448_p11 }
 0x100   : > { %p451_p0 = pnand %p450_p13, %p444_p8 }
 0x102   : > { %454 = shalt.err (!%p451_p0)
}
 0x103   : > { %s494_s17 = smov 128   ;;  %s495_s19 = smov 8  }
 0x104   : > { %379 = dma.vmem_to_hbm [thread:$0]  (%p554_p5), %s585_s24, 256, %s590_s28, %s592_s29, %s494_s17, %s494_s17, %s495_s19  }
 0x105 PF: > { %p385_p1 = scmp.ge.s32.totalorder %s489_s15, 2  ;;  %s295_s20 = sand.u32 1, %s477_s12  }
 0x106   : > { %s296_s25 = scalar_lea.sflag [#allocation3], %s295_s20 }
 0x107   : > { %p382_p2 = pnand %p385_p1, %p558_p6 }
 0x109   : > { %472 = dma.done.wait (!%p382_p2), %s296_s25, 256  }
 0x10a   : > { %474 = vsyncadd (!%p382_p2), %s296_s25, 4294967040  ;;  %p13_p3 = scmp.ge.s32.totalorder %s541_s18, 4   ;;  %s639_s12 = smov %s481_s13 }
 0x10b   : > { %s640_s13 = smov %s485_s14  ;;  %s641_s14 = smov %s552_s21 }
 0x10c   : > { %s642_s15 = smov %s541_s18  ;;  %15 = sbr.rel (!%p13_p3) target bundleno = 3 (0x3), region = 67 }
 0x113   :  { %301 = vsyncpa [#allocation3], 1 }
 0x114   :  { %303 = vsyncpa [#allocation3 + $0x1], 1 }

</bundles_post_ra>
